<compile_context>
chip_gen: v5e
topology: v5e:2x2
jax: 0.10.0
libtpu: 0.0.40
codegen_flags: <defaults>
</compile_context>

<pallas_src>
import functools

import jax
import jax.numpy as jnp
from jax.experimental import pallas as pl
from jax.experimental.pallas import tpu as pltpu


def _round_up(x, m):
    return (x + m - 1) // m * m


# ----------------------------------------------------------------------------- 
# Kernel: one (TB, K) x (K, N_pad) MXU matmul, f32 accumulate, resident bias add.
# -----------------------------------------------------------------------------
def linear_kernel(x_ref, w_ref, b_ref, o_ref):
    acc = jnp.dot(x_ref[...], w_ref[...], preferred_element_type=jnp.float32)
    o_ref[...] = (acc + b_ref[...]).astype(o_ref.dtype)


# -----------------------------------------------------------------------------
# One-time parameter layout prep (hoisted out of the per-call forward).
# -----------------------------------------------------------------------------
def prepare_classifier_u2m_params(w, b, param_dtype=None):
    """w: [n_output, 500] (PyTorch Linear layout), b: [n_output].

    Returns (w_t, b_p, n_output) where
      w_t: [500, N_pad] lane-padded transposed weight (optionally cast),
      b_p: [1, N_pad]   lane-padded f32 bias.
    """
    N, K = w.shape
    assert b.shape == (N,)
    N_pad = _round_up(N, 128)
    w_t = jnp.pad(w.T, ((0, 0), (0, N_pad - N)))            # [K, N_pad], K unpadded
    if param_dtype is not None:
        w_t = w_t.astype(param_dtype)
    b_p = jnp.pad(b, (0, N_pad - N)).reshape(1, N_pad).astype(jnp.float32)
    return w_t, b_p, N


# -----------------------------------------------------------------------------
# Forward.
# -----------------------------------------------------------------------------
@functools.partial(
    jax.jit, static_argnames=("n_output", "force_pallas", "return_padded"))
def classifier_u2m_forward(x, w_t, b_p, *, n_output,
                           force_pallas=False, return_padded=False):
    """x: [B, 500]; w_t/b_p from prepare_classifier_u2m_params.

    Returns [B, n_output] (or [B, N_pad] if return_padded=True).
    """
    B, K = x.shape
    K2, N_pad = w_t.shape
    assert K == K2 and b_p.shape == (1, N_pad)
    out_dtype = x.dtype

    # ---- small-problem fast path: let XLA fuse a plain dot --------------------
    # At demo scale the pallas_call fixed cost (grid setup + DMA descriptors)
    # dominates; the kernel only earns its keep at large B.
    if (not force_pallas) and (B * N_pad <= 128 * 128):
        out_p = (jnp.dot(x, w_t.astype(x.dtype),
                         preferred_element_type=jnp.float32)
                 + b_p).astype(out_dtype)
        return out_p if return_padded else out_p[:, :n_output]

    # ---- batch tile selection --------------------------------------------------
    if B < 128:
        TB = B                                  # full-array dim: always legal
    else:
        TB = min((B // 128) * 128, 2048)        # 2048 f32 fits v5e scoped VMEM
        if B >= 256:
            # keep grid >= 2 so the "parallel" axis can shard across both v7x TCs
            TB = min(TB, _round_up(pl.cdiv(B, 2), 128))
    grid = (pl.cdiv(B, TB),)

    cost = pl.CostEstimate(
        flops=2 * B * K * N_pad,
        transcendentals=0,
        bytes_accessed=(x.size * x.dtype.itemsize
                        + w_t.size * w_t.dtype.itemsize
                        + b_p.size * b_p.dtype.itemsize
                        + B * N_pad * jnp.dtype(out_dtype).itemsize),
    )

    out_p = pl.pallas_call(
        linear_kernel,
        out_shape=jax.ShapeDtypeStruct((B, N_pad), out_dtype),
        grid_spec=pl.GridSpec(
            grid=grid,
            in_specs=[
                # x tile, pipelined over the batch grid; full (unpadded) K lanes.
                pl.BlockSpec((TB, K), lambda i: (i, 0)),
                # weights + bias: grid-invariant -> VMEM-resident across steps.
                pl.BlockSpec((K, N_pad), lambda i: (0, 0)),
                pl.BlockSpec((1, N_pad), lambda i: (0, 0)),
            ],
            out_specs=pl.BlockSpec((TB, N_pad), lambda i: (i, 0)),
        ),
        compiler_params=pltpu.CompilerParams(
            dimension_semantics=("parallel",),
        ),
        cost_estimate=cost,
    )(x, w_t, b_p)

    # Lazy slice of the padded lanes; skip entirely with return_padded=True so a
    # downstream consumer can fuse it.
    return out_p if return_padded else out_p[:, :n_output]


if __name__ == "__main__":
    key = jax.random.PRNGKey(0)
    k_x, k_w, k_b = jax.random.split(key, 3)

    B = 8          # batch
    IN = 500       # fc input features (fixed by the module)
    N_OUT = 10     # n_output

    x = jax.random.normal(k_x, (B, IN), dtype=jnp.float32)

    # Deterministic parameter init (uniform, like PyTorch Linear's default range).
    bound = 1.0 / (IN ** 0.5)
    w = jax.random.uniform(k_w, (N_OUT, IN), minval=-bound, maxval=bound,
                           dtype=jnp.float32)          # PyTorch layout [out, in]
    b = jax.random.uniform(k_b, (N_OUT,), minval=-bound, maxval=bound,
                           dtype=jnp.float32)

    # One-time layout prep (would live in model init in a real deployment).
    w_t, b_p, n_out = prepare_classifier_u2m_params(w, b)

    ref = x @ w.T + b

    # Exercise the Pallas kernel explicitly (small B would otherwise fast-path).
    out = classifier_u2m_forward(x, w_t, b_p, n_output=n_out, force_pallas=True)
    out = jax.block_until_ready(out)
    assert out.shape == (B, N_OUT)
    assert jnp.allclose(out, ref, atol=1e-4, rtol=1e-4)

    # Also check the default-dispatch (small-B fused-dot) path.
    out_fast = classifier_u2m_forward(x, w_t, b_p, n_output=n_out)
    out_fast = jax.block_until_ready(out_fast)
    assert jnp.allclose(out_fast, ref, atol=1e-4, rtol=1e-4)

    print("KERNEL_OK")
</pallas_src>

<mosaic_0001>
module attributes {stable_mosaic.version = 11 : i64} {
  func.func @linear_kernel(%arg0: i32, %arg1: memref<8x500xf32, #tpu.memory_space<vmem>>, %arg2: memref<500x128xf32, #tpu.memory_space<vmem>>, %arg3: memref<1x128xf32, #tpu.memory_space<vmem>>, %arg4: memref<8x128xf32, #tpu.memory_space<vmem>>) attributes {dimension_semantics = [#tpu.dimension_semantics<parallel>], iteration_bounds = array<i64: 1>, scalar_prefetch = 0 : i64, scratch_operands = 0 : i64, tpu.core_type = #tpu.core_type<tc>, window_params = [{transform_indices = @transform_0, window_bounds = array<i64: 8, 500>}, {pipeline_mode = #tpu.pipeline_mode<synchronous>, transform_indices = @transform_1, window_bounds = array<i64: 500, 128>}, {pipeline_mode = #tpu.pipeline_mode<synchronous>, transform_indices = @transform_2, window_bounds = array<i64: 1, 128>}, {transform_indices = @transform_3, window_bounds = array<i64: 8, 128>}]} {
    %c0 = arith.constant 0 : index
    %c0_0 = arith.constant 0 : index
    %0 = vector.load %arg1[%c0, %c0_0] : memref<8x500xf32, #tpu.memory_space<vmem>>, vector<8x500xf32>
    %c0_1 = arith.constant 0 : index
    %c0_2 = arith.constant 0 : index
    %1 = vector.load %arg2[%c0_1, %c0_2] : memref<500x128xf32, #tpu.memory_space<vmem>>, vector<500x128xf32>
    %cst = arith.constant dense<0.000000e+00> : vector<8x128xf32>
    %2 = tpu.matmul %0, %1, %cst {dimension_numbers = #tpu.dot_dimension_numbers<[1], [0], [0], [1], [0, 0, 1, 1], [], []>} : vector<8x500xf32>, vector<500x128xf32>, vector<8x128xf32> -> vector<8x128xf32>
    %c0_3 = arith.constant 0 : index
    %c0_4 = arith.constant 0 : index
    %3 = vector.load %arg3[%c0_3, %c0_4] : memref<1x128xf32, #tpu.memory_space<vmem>>, vector<1x128xf32>
    %4 = vector.broadcast %3 : vector<1x128xf32> to vector<8x128xf32>
    %5 = arith.addf %2, %4 : vector<8x128xf32>
    %c0_5 = arith.constant 0 : index
    %c0_6 = arith.constant 0 : index
    %6 = vector.load %arg4[%c0_5, %c0_6] : memref<8x128xf32, #tpu.memory_space<vmem>>, vector<8x128xf32>
    tpu.vector_store %arg4[%c0_5, %c0_6], %5 {strides = array<i32>} : memref<8x128xf32, #tpu.memory_space<vmem>>, vector<8x128xf32>,
    return
  }
  func.func @transform_0(%arg0: i32) -> (i32, i32) {
    %c0_i32 = arith.constant 0 : i32
    %c0_i32_0 = arith.constant 0 : i32
    return %arg0, %c0_i32 : i32, i32
  }
  func.func @transform_1(%arg0: i32) -> (i32, i32) {
    %c0_i32 = arith.constant 0 : i32
    %c0_i32_0 = arith.constant 0 : i32
    %c0_i32_1 = arith.constant 0 : i32
    return %c0_i32, %c0_i32_0 : i32, i32
  }
  func.func @transform_2(%arg0: i32) -> (i32, i32) {
    %c0_i32 = arith.constant 0 : i32
    %c0_i32_0 = arith.constant 0 : i32
    %c0_i32_1 = arith.constant 0 : i32
    return %c0_i32, %c0_i32_0 : i32, i32
  }
  func.func @transform_3(%arg0: i32) -> (i32, i32) {
    %c0_i32 = arith.constant 0 : i32
    %c0_i32_0 = arith.constant 0 : i32
    return %arg0, %c0_i32 : i32, i32
  }
}

</mosaic_0001>

<bundles_post_ra>
// kernel: classifier_u2m_forward.1
= control target key start
LH: loop header
LB: loop body
LE: loop exit
PB: predicated region body
PF: predicated region fallthrough
CT: control target
= control target key end

     0   :  { %8 = vsyncpa [#allocation3], 0  ;;  %s346_s0 = inlined_call_operand.hbm [shape: f32[8,500], index: 0, kind: input, shape index: {}]   ;;  %s347_s1 = inlined_call_operand.hbm [shape: f32[500,128], index: 1, kind: input, shape index: {}]   ;;  %s348_s2 = inlined_call_operand.vmem [shape: f32[1,128], index: 2, kind: input, shape index: {}]   ;;  %s349_s3 = inlined_call_operand.hbm [shape: f32[8,128], index: 3, kind: output, shape index: {}]  }
   0x1   :  { %9 = vsyncpa [#allocation6], 0 }
   0x2   :  { %10 = vsyncpa [#allocation4], 0  ;;  %s16_s14 = sshll.u32 %s346_s0, 4  ;;  %s309_s15 = smov [#allocation2]   ;;  %s17_s14 = int_to_ptr.hbm [resolvable:$true] %s16_s14 }
   0x3   :  { %s18_s16 = sshll.u32 %s309_s15, 4  ;;  %s26_s19 = sshll.u32 %s347_s1, 4  ;;  %s19_s16 = int_to_ptr.vmem [resolvable:$true] %s18_s16  ;;  %s27_s19 = int_to_ptr.hbm [resolvable:$true] %s26_s19 }
   0x4   :  { %21 = dma.hbm_to_vmem [thread:$0]  %s17_s14, 512, %s19_s16, [#allocation3]  }
   0x5   :  { %s310_s20 = smov [#allocation5]   ;;  %s311_s22 = smov 128  }
   0x6   :  { %s28_s21 = sshll.u32 %s310_s20, 4  ;;  %s312_s23 = smov 8   ;;  %s29_s21 = int_to_ptr.vmem [resolvable:$true] %s28_s21 }
   0x7   :  { %34 = dma.hbm_to_vmem [thread:$0]  %s27_s19, 8064, %s29_s21, [#allocation6], %s311_s22, %s311_s22, %s312_s23  }
   0x8   :  { %303 = dma.done.wait [#allocation3], 512  }
   0x9   :  { %304 = vsyncadd [#allocation3], 4294966784 }
   0xa   :  { %305 = dma.done.wait [#allocation6], 8064  }
   0xb   :  { %306 = vsyncadd [#allocation6], 4294959232  ;;  %v96_v0 = vld [vmem:[#allocation5 + $0x178] sm:$0xff]  ;;  %v95_v2 = vld [vmem:[#allocation5 + $0x170] sm:$0xff]  ;;  %vm120_vm0 = vcmask 1043456   ;;  %vm116_vm1 = vcmask 949248  }
   0xc   :  { %v64_v1 = vld [vmem:[#allocation5 + $0x78] sm:$0xff]  ;;  %164 = vmatpush.msra.mxu2 %v96_v0  ;;  %v63_v3 = vld [vmem:[#allocation5 + $0x70] sm:$0xff]  ;;  %v94_v5 = vld [vmem:[#allocation5 + $0x168] sm:$0xff]  ;;  %s313_s24 = smov [#allocation7]   ;;  %s212_s28 = sshll.u32 %s349_s3, 4  ;;  %s213_s28 = int_to_ptr.hbm [resolvable:$true] %s212_s28 }
   0xd   :  { %124 = vmatpush.msra.mxu0 %v64_v1  ;;  %v80_v4 = vld [vmem:[#allocation5 + $0xf8] sm:$0xff]  ;;  %v111_v6 = vld [vmem:[#allocation5 + $0x1f0] sm:$0xf]  ;;  %v62_v7 = vld [vmem:[#allocation5 + $0x68] sm:$0xff]  ;;  %s210_s25 = sshll.u32 %s313_s24, 4  ;;  %s211_s25 = int_to_ptr.vmem [resolvable:$true] %s210_s25 }
   0xe   :  { %144 = vmatpush.msra.mxu1 %v80_v4  ;;  %v79_v8 = vld [vmem:[#allocation5 + $0xf0] sm:$0xff]  ;;  %165 = vmatpush.msra.mxu2 %v95_v2  ;;  %v110_v9 = vld [vmem:[#allocation5 + $0x1e8] sm:$0xff]  ;;  %v93_v10 = vld [vmem:[#allocation5 + $0x160] sm:$0xff] }
   0xf   :  { %125 = vmatpush.msra.mxu0 %v63_v3  ;;  %223 = vmatpush.msk.msra.mxu3 %vm120_vm0, %v111_v6  ;;  %v61_v11 = vld [vmem:[#allocation5 + $0x60] sm:$0xff]  ;;  %v78_v12 = vld [vmem:[#allocation5 + $0xe8] sm:$0xff]  ;;  %v92_v15 = vld [vmem:[#allocation5 + $0x158] sm:$0xff] }
  0x10   :  { %145 = vmatpush.msra.mxu1 %v79_v8  ;;  %166 = vmatpush.msra.mxu2 %v94_v5  ;;  %v109_v13 = vld [vmem:[#allocation5 + $0x1e0] sm:$0xff]  ;;  %v60_v16 = vld [vmem:[#allocation5 + $0x58] sm:$0xff]  ;;  %v91_v19 = vld [vmem:[#allocation5 + $0x150] sm:$0xff] }
  0x11   :  { %126 = vmatpush.msra.mxu0 %v62_v7  ;;  %v77_v14 = vld [vmem:[#allocation5 + $0xe0] sm:$0xff]  ;;  %186 = vmatpush.msra.mxu3 %v110_v9  ;;  %v108_v17 = vld [vmem:[#allocation5 + $0x1d8] sm:$0xff]  ;;  %v59_v20 = vld [vmem:[#allocation5 + $0x50] sm:$0xff] }
  0x12   :  { %146 = vmatpush.msra.mxu1 %v78_v12  ;;  %167 = vmatpush.msra.mxu2 %v93_v10  ;;  %v76_v18 = vld [vmem:[#allocation5 + $0xd8] sm:$0xff]  ;;  %v107_v21 = vld [vmem:[#allocation5 + $0x1d0] sm:$0xff]  ;;  %v90_v23 = vld [vmem:[#allocation5 + $0x148] sm:$0xff] }
  0x13   :  { %127 = vmatpush.msra.mxu0 %v61_v11  ;;  %187 = vmatpush.msra.mxu3 %v109_v13  ;;  %v75_v22 = vld [vmem:[#allocation5 + $0xd0] sm:$0xff]  ;;  %v58_v24 = vld [vmem:[#allocation5 + $0x48] sm:$0xff]  ;;  %v89_v27 = vld [vmem:[#allocation5 + $0x140] sm:$0xff] }
  0x14   :  { %147 = vmatpush.msra.mxu1 %v77_v14  ;;  %168 = vmatpush.msra.mxu2 %v92_v15  ;;  %v106_v25 = vld [vmem:[#allocation5 + $0x1c8] sm:$0xff]  ;;  %v57_v28 = vld [vmem:[#allocation5 + $0x40] sm:$0xff]  ;;  %v88_v31 = vld [vmem:[#allocation5 + $0x138] sm:$0xff] }
  0x15   :  { %128 = vmatpush.msra.mxu0 %v60_v16  ;;  %188 = vmatpush.msra.mxu3 %v108_v17  ;;  %v74_v26 = vld [vmem:[#allocation5 + $0xc8] sm:$0xff]  ;;  %v105_v29 = vld [vmem:[#allocation5 + $0x1c0] sm:$0xff]  ;;  %v56_v32 = vld [vmem:[#allocation5 + $0x38] sm:$0xff] }
  0x16   :  { %148 = vmatpush.msra.mxu1 %v76_v18  ;;  %169 = vmatpush.msra.mxu2 %v91_v19  ;;  %v73_v30 = vld [vmem:[#allocation5 + $0xc0] sm:$0xff]  ;;  %v104_v33 = vld [vmem:[#allocation5 + $0x1b8] sm:$0xff]  ;;  %v87_v35 = vld [vmem:[#allocation5 + $0x130] sm:$0xff] }
  0x17   :  { %129 = vmatpush.msra.mxu0 %v59_v20  ;;  %189 = vmatpush.msra.mxu3 %v107_v21  ;;  %v72_v34 = vld [vmem:[#allocation5 + $0xb8] sm:$0xff]  ;;  %v55_v36 = vld [vmem:[#allocation5 + $0x30] sm:$0xff]  ;;  %v86_v39 = vld [vmem:[#allocation5 + $0x128] sm:$0xff] }
  0x18   :  { %149 = vmatpush.msra.mxu1 %v75_v22  ;;  %170 = vmatpush.msra.mxu2 %v90_v23  ;;  %v103_v37 = vld [vmem:[#allocation5 + $0x1b0] sm:$0xff]  ;;  %v54_v40 = vld [vmem:[#allocation5 + $0x28] sm:$0xff]  ;;  %v85_v43 = vld [vmem:[#allocation5 + $0x120] sm:$0xff] }
  0x19   :  { %130 = vmatpush.msra.mxu0 %v58_v24  ;;  %190 = vmatpush.msra.mxu3 %v106_v25  ;;  %v71_v38 = vld [vmem:[#allocation5 + $0xb0] sm:$0xff]  ;;  %v102_v41 = vld [vmem:[#allocation5 + $0x1a8] sm:$0xff]  ;;  %v53_v44 = vld [vmem:[#allocation5 + $0x20] sm:$0xff] }
  0x1a   :  { %150 = vmatpush.msra.mxu1 %v74_v26  ;;  %171 = vmatpush.msra.mxu2 %v89_v27  ;;  %v70_v42 = vld [vmem:[#allocation5 + $0xa8] sm:$0xff]  ;;  %v101_v45 = vld [vmem:[#allocation5 + $0x1a0] sm:$0xff]  ;;  %v84_v47 = vld [vmem:[#allocation5 + $0x118] sm:$0xff] }
  0x1b   :  { %131 = vmatpush.msra.mxu0 %v57_v28  ;;  %191 = vmatpush.msra.mxu3 %v105_v29  ;;  %v69_v46 = vld [vmem:[#allocation5 + $0xa0] sm:$0xff]  ;;  %v52_v48 = vld [vmem:[#allocation5 + $0x18] sm:$0xff]  ;;  %v83_v51 = vld [vmem:[#allocation5 + $0x110] sm:$0xff] }
  0x1c   :  { %151 = vmatpush.msra.mxu1 %v73_v30  ;;  %172 = vmatpush.msra.mxu2 %v88_v31  ;;  %v100_v49 = vld [vmem:[#allocation5 + $0x198] sm:$0xff]  ;;  %v51_v52 = vld [vmem:[#allocation5 + $0x10] sm:$0xff]  ;;  %v82_v55 = vld [vmem:[#allocation5 + $0x108] sm:$0xff] }
  0x1d   :  { %132 = vmatpush.msra.mxu0 %v56_v32  ;;  %192 = vmatpush.msra.mxu3 %v104_v33  ;;  %v68_v50 = vld [vmem:[#allocation5 + $0x98] sm:$0xff]  ;;  %v99_v53 = vld [vmem:[#allocation5 + $0x190] sm:$0xff]  ;;  %v50_v56 = vld [vmem:[#allocation5 + $0x8] sm:$0xff] }
  0x1e   :  { %152 = vmatpush.msra.mxu1 %v72_v34  ;;  %173 = vmatpush.msra.mxu2 %v87_v35  ;;  %v67_v54 = vld [vmem:[#allocation5 + $0x90] sm:$0xff]  ;;  %v98_v57 = vld [vmem:[#allocation5 + $0x188] sm:$0xff]  ;;  %v81_v59 = vld [vmem:[#allocation5 + $0x100] sm:$0xff] }
  0x1f   :  { %133 = vmatpush.msra.mxu0 %v55_v36  ;;  %193 = vmatpush.msra.mxu3 %v103_v37  ;;  %v66_v58 = vld [vmem:[#allocation5 + $0x88] sm:$0xff]  ;;  %v49_v60 = vld [vmem:[#allocation5] sm:$0xff]  ;;  %v47_v61 = vld [vmem:[#allocation2 + $0x10] sm:$0xff] }
  0x20   :  { %153 = vmatpush.msra.mxu1 %v71_v38  ;;  %174 = vmatpush.msra.mxu2 %v86_v39  ;;  %v97_v62 = vld [vmem:[#allocation5 + $0x180] sm:$0xff]  ;;  %v48_v0 = vld [vmem:[#allocation2 + $0x18] sm:$0xff]  ;;  %v46_v2 = vld [vmem:[#allocation2 + $0x8] sm:$0xff] }
  0x21   :  { %134 = vmatpush.msra.mxu0 %v54_v40  ;;  %194 = vmatpush.msra.mxu3 %v102_v41  ;;  %v45_v63 = vld [vmem:[#allocation2] sm:$0xff] }
  0x22   :  { %154 = vmatpush.msra.mxu1 %v70_v42  ;;  %175 = vmatpush.msra.mxu2 %v85_v43  ;;  %v65_v1 = vld [vmem:[#allocation5 + $0x80] sm:$0xff] }
  0x23   :  { %135 = vmatpush.msra.mxu0 %v53_v44  ;;  %195 = vmatpush.msra.mxu3 %v101_v45  ;;  %v230_v3 = vld [vmem:[%s348_s2] ss:$0 sm:$0xff] }
  0x24   :  { %155 = vmatpush.msra.mxu1 %v69_v46  ;;  %176 = vmatpush.msra.mxu2 %v84_v47 }
  0x25   :  { %136 = vmatpush.msra.mxu0 %v52_v48  ;;  %196 = vmatpush.msra.mxu3 %v100_v49 }
  0x26   :  { %156 = vmatpush.msra.mxu1 %v68_v50  ;;  %177 = vmatpush.msra.mxu2 %v83_v51 }
  0x27   :  { %137 = vmatpush.msra.mxu0 %v51_v52  ;;  %197 = vmatpush.msra.mxu3 %v99_v53 }
  0x28   :  { %157 = vmatpush.msra.mxu1 %v67_v54  ;;  %178 = vmatpush.msra.mxu2 %v82_v55 }
  0x29   :  { %138 = vmatpush.msra.mxu0 %v50_v56  ;;  %198 = vmatpush.msra.mxu3 %v98_v57 }
  0x2a   :  { %158 = vmatpush.msra.mxu1 %v66_v58  ;;  %179 = vmatpush.msra.mxu2 %v81_v59 }
  0x2b   :  { %139 = vmatpush.msra.mxu0 %v49_v60  ;;  %180 = vmatmul.f32.vlgmr.msra.gmra.mxu2 %v47_v61 }
  0x2c   :  { %199 = vmatpush.msra.mxu3 %v97_v62  ;;  %140 = vmatmul.f32.vlgmr.msra.gmra.mxu0 %v45_v63 }
  0x2d   :  { %224 = vmatmul.msk.f32.vlgmr.msra.gmra.mxu3 %vm116_vm1, %v48_v0  ;;  %159 = vmatpush.msra.mxu1 %v65_v1 }
  0x2e   :  { %160 = vmatmul.f32.vlgmr.msra.gmra.mxu1 %v46_v2 }
  0xa9   :  { %v141_v4 = vpop.f32.mrf.mxu0 }
  0xaa   :  { %v142_v5 = vadd.f32 %v230_v3, %v141_v4 }
  0xab   :  { %v161_v6 = vpop.f32.mrf.mxu1 }
  0xac   :  { %v162_v7 = vadd.f32 %v161_v6, %v142_v5 }
  0xae   :  { %v181_v8 = vpop.f32.mrf.mxu2 }
  0xaf   :  { %v182_v9 = vadd.f32 %v181_v8, %v162_v7 }
  0xb0   :  { %v201_v10 = vpop.f32.mrf.mxu3 }
  0xb1   :  { %v202_v11 = vadd.f32 %v201_v10, %v182_v9 }
  0xb3   :  { %204 = vst [vmem:[#allocation7] sm:$0xff] %v202_v11 }
  0xb4   :  { %215 = dma.vmem_to_hbm [thread:$0]  %s211_s25, 128, %s213_s28, [#allocation4]  }
  0xb5   :  { %307 = dma.done.wait [#allocation4], 128  }
  0xb6   :  { %308 = vsyncadd [#allocation4], 4294967168 }
  0xb7   :  { %220 = vsyncpa [#allocation3], 1 }
  0xb8   :  { %221 = vsyncpa [#allocation6], 1 }
  0xb9   :  { %222 = vsyncpa [#allocation4], 1 }

</bundles_post_ra>
